<compile_context>
chip_gen: v5e
topology: v5e:2x2
jax: 0.10.0
libtpu: 0.0.40
codegen_flags: <defaults>
</compile_context>

<pallas_src>
import jax
import jax.numpy as jnp
from jax.experimental import pallas as pl
from jax.experimental.pallas import tpu as pltpu


def _make_kernel(n_linears, activation):
    def kernel(*refs):
        # refs = (x, U1t, b1t, U2t, b2t, W0t, c0t, ..., W{L-1}t, c{L-1}t, out)
        # All activation tiles are feature-major: (features, tm), points on lanes.
        x_ref = refs[0]
        U1_ref, b1_ref, U2_ref, b2_ref = refs[1:5]
        wb = refs[5:5 + 2 * n_linears]
        out_ref = refs[5 + 2 * n_linears]

        x = x_ref[...]                                        # (in_dim, tm)

        U = activation(
            jnp.dot(U1_ref[...], x, preferred_element_type=jnp.float32)
            + b1_ref[...]
        )                                                     # (hidden, tm)
        V = activation(
            jnp.dot(U2_ref[...], x, preferred_element_type=jnp.float32)
            + b2_ref[...]
        )
        dUV = U - V                                           # hoisted gate term

        h = x
        for i in range(n_linears - 1):
            W = wb[2 * i][...]                                # (out_i, in_i)
            c = wb[2 * i + 1][...]                            # (out_i, 1)
            h = activation(
                jnp.dot(W, h, preferred_element_type=jnp.float32) + c
            )
            # h*U + (1-h)*V  ==  V + h*(U - V)   (one mul + one add per elem)
            h = V + h * dUV

        W = wb[-2][...]
        c = wb[-1][...]
        out_ref[...] = (
            jnp.dot(W, h, preferred_element_type=jnp.float32) + c
        ).astype(out_ref.dtype)

    return kernel


def modified_mlp_pallas(x, params, *, activation=jnp.tanh, tm=256):
    """x: (N, in_dim). params: dict with U1,b1,U2,b2 and lists Ws (in,out), cs (1,out)."""
    N, in_dim = x.shape
    Ws, cs = params["Ws"], params["cs"]
    n_linears = len(Ws)
    out_dim = Ws[-1].shape[1]

    # Feature-major data: points on the lane axis, padded to a tile multiple.
    n_pad = pl.cdiv(N, tm) * tm
    xt = x.T                                                  # (in_dim, N)
    if n_pad != N:
        xt = jnp.pad(xt, ((0, 0), (0, n_pad - N)))
    grid = (n_pad // tm,)

    # Weights transposed to (out, in); biases to (out, 1) (broadcast over lanes).
    flat_params = [params["U1"].T, params["b1"].T, params["U2"].T, params["b2"].T]
    for W, c in zip(Ws, cs):
        flat_params += [W.T, c.T]

    in_specs = [pl.BlockSpec((in_dim, tm), lambda i: (0, i))]
    # Parameters are tiny (<20 KiB total): pass as full untiled VMEM blocks.
    in_specs += [pl.BlockSpec(p.shape, lambda i: (0, 0)) for p in flat_params]
    # Lane-dense output block: last dim tm is a multiple of 128 -> unmasked vst.
    out_spec = pl.BlockSpec((out_dim, tm), lambda i: (0, i))

    kernel = _make_kernel(n_linears, activation)

    out_t = pl.pallas_call(
        kernel,
        out_shape=jax.ShapeDtypeStruct((out_dim, n_pad), jnp.float32),
        grid_spec=pltpu.PrefetchScalarGridSpec(
            num_scalar_prefetch=0,
            grid=grid,
            in_specs=in_specs,
            out_specs=out_spec,
        ),
        compiler_params=pltpu.CompilerParams(
            dimension_semantics=("parallel",)  # >=2 grid steps -> both v7x TCs
        ),
    )(xt, *flat_params)

    return out_t[:, :N].T                                     # (N, out_dim)


def init_params(key, layers):
    """Deterministic xavier_normal weights, zero biases (matches __init__)."""
    def xavier(k, fan_in, fan_out):
        std = jnp.sqrt(2.0 / (fan_in + fan_out))
        return std * jax.random.normal(k, (fan_in, fan_out), dtype=jnp.float32)

    keys = jax.random.split(key, 2 + (len(layers) - 1))
    params = {
        "U1": xavier(keys[0], layers[0], layers[1]),
        "b1": jnp.zeros((1, layers[1]), jnp.float32),
        "U2": xavier(keys[1], layers[0], layers[1]),
        "b2": jnp.zeros((1, layers[1]), jnp.float32),
        "Ws": [],
        "cs": [],
    }
    for i in range(len(layers) - 1):
        params["Ws"].append(xavier(keys[2 + i], layers[i], layers[i + 1]))
        params["cs"].append(jnp.zeros((1, layers[i + 1]), jnp.float32))
    return params


def modified_mlp_ref(x, params, activation=jnp.tanh):
    """Pure-JAX reference mirroring the PyTorch forward exactly."""
    U = activation(x @ params["U1"] + params["b1"])
    V = activation(x @ params["U2"] + params["b2"])
    h = x
    for W, c in zip(params["Ws"][:-1], params["cs"][:-1]):
        h = activation(h @ W + c)
        h = h * U + (1.0 - h) * V
    return h @ params["Ws"][-1] + params["cs"][-1]


if __name__ == "__main__":
    # Small shapes consistent with the 2D-advection PINN usage:
    # layers = [in_dim, hidden, hidden, hidden, out_dim], activation = tanh.
    layers = [4, 32, 32, 32, 1]
    N = 1024  # collocation points (rows); tm=256 -> 4-step parallel grid

    key = jax.random.PRNGKey(0)
    kx, kp = jax.random.split(key)
    x = jax.random.normal(kx, (N, layers[0]), dtype=jnp.float32)
    params = init_params(kp, layers)

    out = modified_mlp_pallas(x, params, activation=jnp.tanh, tm=256)
    out = jax.block_until_ready(out)

    ref = modified_mlp_ref(x, params)
    assert out.shape == (N, layers[-1])
    assert jnp.allclose(out, ref, atol=1e-5, rtol=1e-5), (
        float(jnp.max(jnp.abs(out - ref)))
    )
    print("KERNEL_OK")
</pallas_src>

<mosaic_0001>
module attributes {stable_mosaic.version = 11 : i64} {
  func.func @kernel(%arg0: i32, %arg1: memref<4x256xf32, #tpu.memory_space<vmem>>, %arg2: memref<32x4xf32, #tpu.memory_space<vmem>>, %arg3: memref<32x1xf32, #tpu.memory_space<vmem>>, %arg4: memref<32x4xf32, #tpu.memory_space<vmem>>, %arg5: memref<32x1xf32, #tpu.memory_space<vmem>>, %arg6: memref<32x4xf32, #tpu.memory_space<vmem>>, %arg7: memref<32x1xf32, #tpu.memory_space<vmem>>, %arg8: memref<32x32xf32, #tpu.memory_space<vmem>>, %arg9: memref<32x1xf32, #tpu.memory_space<vmem>>, %arg10: memref<32x32xf32, #tpu.memory_space<vmem>>, %arg11: memref<32x1xf32, #tpu.memory_space<vmem>>, %arg12: memref<1x32xf32, #tpu.memory_space<vmem>>, %arg13: memref<1x1xf32, #tpu.memory_space<vmem>>, %arg14: memref<1x256xf32, #tpu.memory_space<vmem>>) attributes {dimension_semantics = [#tpu.dimension_semantics<parallel>], iteration_bounds = array<i64: 4>, scalar_prefetch = 0 : i64, scratch_operands = 0 : i64, tpu.core_type = #tpu.core_type<tc>, window_params = [{transform_indices = @transform_0, window_bounds = array<i64: 4, 256>}, {pipeline_mode = #tpu.pipeline_mode<synchronous>, transform_indices = @transform_1, window_bounds = array<i64: 32, 4>}, {pipeline_mode = #tpu.pipeline_mode<synchronous>, transform_indices = @transform_2, window_bounds = array<i64: 32, 1>}, {pipeline_mode = #tpu.pipeline_mode<synchronous>, transform_indices = @transform_3, window_bounds = array<i64: 32, 4>}, {pipeline_mode = #tpu.pipeline_mode<synchronous>, transform_indices = @transform_4, window_bounds = array<i64: 32, 1>}, {pipeline_mode = #tpu.pipeline_mode<synchronous>, transform_indices = @transform_5, window_bounds = array<i64: 32, 4>}, {pipeline_mode = #tpu.pipeline_mode<synchronous>, transform_indices = @transform_6, window_bounds = array<i64: 32, 1>}, {pipeline_mode = #tpu.pipeline_mode<synchronous>, transform_indices = @transform_7, window_bounds = array<i64: 32, 32>}, {pipeline_mode = #tpu.pipeline_mode<synchronous>, transform_indices = @transform_8, window_bounds = array<i64: 32, 1>}, {pipeline_mode = #tpu.pipeline_mode<synchronous>, transform_indices = @transform_9, window_bounds = array<i64: 32, 32>}, {pipeline_mode = #tpu.pipeline_mode<synchronous>, transform_indices = @transform_10, window_bounds = array<i64: 32, 1>}, {pipeline_mode = #tpu.pipeline_mode<synchronous>, transform_indices = @transform_11, window_bounds = array<i64: 1, 32>}, {pipeline_mode = #tpu.pipeline_mode<synchronous>, transform_indices = @transform_12, window_bounds = array<i64: 1, 1>}, {transform_indices = @transform_13, window_bounds = array<i64: 1, 256>}]} {
    %c0 = arith.constant 0 : index
    %c0_0 = arith.constant 0 : index
    %0 = vector.load %arg1[%c0, %c0_0] : memref<4x256xf32, #tpu.memory_space<vmem>>, vector<4x256xf32>
    %c0_1 = arith.constant 0 : index
    %c0_2 = arith.constant 0 : index
    %1 = vector.load %arg2[%c0_1, %c0_2] : memref<32x4xf32, #tpu.memory_space<vmem>>, vector<32x4xf32>
    %cst = arith.constant dense<0.000000e+00> : vector<32x256xf32>
    %2 = tpu.matmul %1, %0, %cst {dimension_numbers = #tpu.dot_dimension_numbers<[1], [0], [0], [1], [0, 0, 1, 1], [], []>} : vector<32x4xf32>, vector<4x256xf32>, vector<32x256xf32> -> vector<32x256xf32>
    %c0_3 = arith.constant 0 : index
    %c0_4 = arith.constant 0 : index
    %3 = vector.load %arg3[%c0_3, %c0_4] : memref<32x1xf32, #tpu.memory_space<vmem>>, vector<32x1xf32>
    %4 = vector.broadcast %3 : vector<32x1xf32> to vector<32x256xf32>
    %5 = arith.addf %2, %4 : vector<32x256xf32>
    %6 = math.tanh %5 : vector<32x256xf32>
    %c0_5 = arith.constant 0 : index
    %c0_6 = arith.constant 0 : index
    %7 = vector.load %arg4[%c0_5, %c0_6] : memref<32x4xf32, #tpu.memory_space<vmem>>, vector<32x4xf32>
    %cst_7 = arith.constant dense<0.000000e+00> : vector<32x256xf32>
    %8 = tpu.matmul %7, %0, %cst_7 {dimension_numbers = #tpu.dot_dimension_numbers<[1], [0], [0], [1], [0, 0, 1, 1], [], []>} : vector<32x4xf32>, vector<4x256xf32>, vector<32x256xf32> -> vector<32x256xf32>
    %c0_8 = arith.constant 0 : index
    %c0_9 = arith.constant 0 : index
    %9 = vector.load %arg5[%c0_8, %c0_9] : memref<32x1xf32, #tpu.memory_space<vmem>>, vector<32x1xf32>
    %10 = vector.broadcast %9 : vector<32x1xf32> to vector<32x256xf32>
    %11 = arith.addf %8, %10 : vector<32x256xf32>
    %12 = math.tanh %11 : vector<32x256xf32>
    %13 = arith.subf %6, %12 : vector<32x256xf32>
    %c0_10 = arith.constant 0 : index
    %c0_11 = arith.constant 0 : index
    %14 = vector.load %arg6[%c0_10, %c0_11] : memref<32x4xf32, #tpu.memory_space<vmem>>, vector<32x4xf32>
    %c0_12 = arith.constant 0 : index
    %c0_13 = arith.constant 0 : index
    %15 = vector.load %arg7[%c0_12, %c0_13] : memref<32x1xf32, #tpu.memory_space<vmem>>, vector<32x1xf32>
    %cst_14 = arith.constant dense<0.000000e+00> : vector<32x256xf32>
    %16 = tpu.matmul %14, %0, %cst_14 {dimension_numbers = #tpu.dot_dimension_numbers<[1], [0], [0], [1], [0, 0, 1, 1], [], []>} : vector<32x4xf32>, vector<4x256xf32>, vector<32x256xf32> -> vector<32x256xf32>
    %17 = vector.broadcast %15 : vector<32x1xf32> to vector<32x256xf32>
    %18 = arith.addf %16, %17 : vector<32x256xf32>
    %19 = math.tanh %18 : vector<32x256xf32>
    %20 = arith.mulf %19, %13 : vector<32x256xf32>
    %21 = arith.addf %12, %20 : vector<32x256xf32>
    %c0_15 = arith.constant 0 : index
    %c0_16 = arith.constant 0 : index
    %22 = vector.load %arg8[%c0_15, %c0_16] : memref<32x32xf32, #tpu.memory_space<vmem>>, vector<32x32xf32>
    %c0_17 = arith.constant 0 : index
    %c0_18 = arith.constant 0 : index
    %23 = vector.load %arg9[%c0_17, %c0_18] : memref<32x1xf32, #tpu.memory_space<vmem>>, vector<32x1xf32>
    %cst_19 = arith.constant dense<0.000000e+00> : vector<32x256xf32>
    %24 = tpu.matmul %22, %21, %cst_19 {dimension_numbers = #tpu.dot_dimension_numbers<[1], [0], [0], [1], [0, 0, 1, 1], [], []>} : vector<32x32xf32>, vector<32x256xf32>, vector<32x256xf32> -> vector<32x256xf32>
    %25 = vector.broadcast %23 : vector<32x1xf32> to vector<32x256xf32>
    %26 = arith.addf %24, %25 : vector<32x256xf32>
    %27 = math.tanh %26 : vector<32x256xf32>
    %28 = arith.mulf %27, %13 : vector<32x256xf32>
    %29 = arith.addf %12, %28 : vector<32x256xf32>
    %c0_20 = arith.constant 0 : index
    %c0_21 = arith.constant 0 : index
    %30 = vector.load %arg10[%c0_20, %c0_21] : memref<32x32xf32, #tpu.memory_space<vmem>>, vector<32x32xf32>
    %c0_22 = arith.constant 0 : index
    %c0_23 = arith.constant 0 : index
    %31 = vector.load %arg11[%c0_22, %c0_23] : memref<32x1xf32, #tpu.memory_space<vmem>>, vector<32x1xf32>
    %cst_24 = arith.constant dense<0.000000e+00> : vector<32x256xf32>
    %32 = tpu.matmul %30, %29, %cst_24 {dimension_numbers = #tpu.dot_dimension_numbers<[1], [0], [0], [1], [0, 0, 1, 1], [], []>} : vector<32x32xf32>, vector<32x256xf32>, vector<32x256xf32> -> vector<32x256xf32>
    %33 = vector.broadcast %31 : vector<32x1xf32> to vector<32x256xf32>
    %34 = arith.addf %32, %33 : vector<32x256xf32>
    %35 = math.tanh %34 : vector<32x256xf32>
    %36 = arith.mulf %35, %13 : vector<32x256xf32>
    %37 = arith.addf %12, %36 : vector<32x256xf32>
    %c0_25 = arith.constant 0 : index
    %c0_26 = arith.constant 0 : index
    %38 = vector.load %arg12[%c0_25, %c0_26] : memref<1x32xf32, #tpu.memory_space<vmem>>, vector<1x32xf32>
    %c0_27 = arith.constant 0 : index
    %c0_28 = arith.constant 0 : index
    %39 = vector.load %arg13[%c0_27, %c0_28] : memref<1x1xf32, #tpu.memory_space<vmem>>, vector<1x1xf32>
    %cst_29 = arith.constant dense<0.000000e+00> : vector<1x256xf32>
    %40 = tpu.matmul %38, %37, %cst_29 {dimension_numbers = #tpu.dot_dimension_numbers<[1], [0], [0], [1], [0, 0, 1, 1], [], []>} : vector<1x32xf32>, vector<32x256xf32>, vector<1x256xf32> -> vector<1x256xf32>
    %41 = vector.broadcast %39 : vector<1x1xf32> to vector<1x256xf32>
    %42 = arith.addf %40, %41 : vector<1x256xf32>
    %c0_30 = arith.constant 0 : index
    %c0_31 = arith.constant 0 : index
    %43 = vector.load %arg14[%c0_30, %c0_31] : memref<1x256xf32, #tpu.memory_space<vmem>>, vector<1x256xf32>
    tpu.vector_store %arg14[%c0_30, %c0_31], %42 {strides = array<i32>} : memref<1x256xf32, #tpu.memory_space<vmem>>, vector<1x256xf32>,
    return
  }
  func.func @transform_0(%arg0: i32) -> (i32, i32) {
    %c0_i32 = arith.constant 0 : i32
    %c0_i32_0 = arith.constant 0 : i32
    return %c0_i32, %arg0 : i32, i32
  }
  func.func @transform_1(%arg0: i32) -> (i32, i32) {
    %c0_i32 = arith.constant 0 : i32
    %c0_i32_0 = arith.constant 0 : i32
    %c0_i32_1 = arith.constant 0 : i32
    return %c0_i32, %c0_i32_0 : i32, i32
  }
  func.func @transform_2(%arg0: i32) -> (i32, i32) {
    %c0_i32 = arith.constant 0 : i32
    %c0_i32_0 = arith.constant 0 : i32
    %c0_i32_1 = arith.constant 0 : i32
    return %c0_i32, %c0_i32_0 : i32, i32
  }
  func.func @transform_3(%arg0: i32) -> (i32, i32) {
    %c0_i32 = arith.constant 0 : i32
    %c0_i32_0 = arith.constant 0 : i32
    %c0_i32_1 = arith.constant 0 : i32
    return %c0_i32, %c0_i32_0 : i32, i32
  }
  func.func @transform_4(%arg0: i32) -> (i32, i32) {
    %c0_i32 = arith.constant 0 : i32
    %c0_i32_0 = arith.constant 0 : i32
    %c0_i32_1 = arith.constant 0 : i32
    return %c0_i32, %c0_i32_0 : i32, i32
  }
  func.func @transform_5(%arg0: i32) -> (i32, i32) {
    %c0_i32 = arith.constant 0 : i32
    %c0_i32_0 = arith.constant 0 : i32
    %c0_i32_1 = arith.constant 0 : i32
    return %c0_i32, %c0_i32_0 : i32, i32
  }
  func.func @transform_6(%arg0: i32) -> (i32, i32) {
    %c0_i32 = arith.constant 0 : i32
    %c0_i32_0 = arith.constant 0 : i32
    %c0_i32_1 = arith.constant 0 : i32
    return %c0_i32, %c0_i32_0 : i32, i32
  }
  func.func @transform_7(%arg0: i32) -> (i32, i32) {
    %c0_i32 = arith.constant 0 : i32
    %c0_i32_0 = arith.constant 0 : i32
    %c0_i32_1 = arith.constant 0 : i32
    return %c0_i32, %c0_i32_0 : i32, i32
  }
  func.func @transform_8(%arg0: i32) -> (i32, i32) {
    %c0_i32 = arith.constant 0 : i32
    %c0_i32_0 = arith.constant 0 : i32
    %c0_i32_1 = arith.constant 0 : i32
    return %c0_i32, %c0_i32_0 : i32, i32
  }
  func.func @transform_9(%arg0: i32) -> (i32, i32) {
    %c0_i32 = arith.constant 0 : i32
    %c0_i32_0 = arith.constant 0 : i32
    %c0_i32_1 = arith.constant 0 : i32
    return %c0_i32, %c0_i32_0 : i32, i32
  }
  func.func @transform_10(%arg0: i32) -> (i32, i32) {
    %c0_i32 = arith.constant 0 : i32
    %c0_i32_0 = arith.constant 0 : i32
    %c0_i32_1 = arith.constant 0 : i32
    return %c0_i32, %c0_i32_0 : i32, i32
  }
  func.func @transform_11(%arg0: i32) -> (i32, i32) {
    %c0_i32 = arith.constant 0 : i32
    %c0_i32_0 = arith.constant 0 : i32
    %c0_i32_1 = arith.constant 0 : i32
    return %c0_i32, %c0_i32_0 : i32, i32
  }
  func.func @transform_12(%arg0: i32) -> (i32, i32) {
    %c0_i32 = arith.constant 0 : i32
    %c0_i32_0 = arith.constant 0 : i32
    %c0_i32_1 = arith.constant 0 : i32
    return %c0_i32, %c0_i32_0 : i32, i32
  }
  func.func @transform_13(%arg0: i32) -> (i32, i32) {
    %c0_i32 = arith.constant 0 : i32
    %c0_i32_0 = arith.constant 0 : i32
    return %c0_i32, %arg0 : i32, i32
  }
}

</mosaic_0001>

<bundles_post_ra>
// kernel: tpu_custom_call.1
= control target key start
LH: loop header
LB: loop body
LE: loop exit
PB: predicated region body
PF: predicated region fallthrough
CT: control target
= control target key end

     0   :  { %s1880_s0 = inlined_call_operand.vmem [shape: f32[4,1024], index: 0, kind: input, shape index: {}]   ;;  %s1881_s1 = inlined_call_operand.vmem [shape: f32[32,4], index: 1, kind: input, shape index: {}]   ;;  %s1882_s2 = inlined_call_operand.vmem [shape: f32[32,1], index: 2, kind: input, shape index: {}]   ;;  %s1883_s3 = inlined_call_operand.vmem [shape: f32[32,4], index: 3, kind: input, shape index: {}]   ;;  %s1884_s4 = inlined_call_operand.vmem [shape: f32[32,1], index: 4, kind: input, shape index: {}]   ;;  %s1885_s5 = inlined_call_operand.vmem [shape: f32[32,4], index: 5, kind: input, shape index: {}]   ;;  %s1886_s6 = inlined_call_operand.vmem [shape: f32[32,1], index: 6, kind: input, shape index: {}]   ;;  %s1887_s7 = inlined_call_operand.vmem [shape: f32[32,32], index: 7, kind: input, shape index: {}]   ;;  %s1888_s8 = inlined_call_operand.vmem [shape: f32[32,1], index: 8, kind: input, shape index: {}]   ;;  %s1889_s9 = inlined_call_operand.vmem [shape: f32[32,32], index: 9, kind: input, shape index: {}]   ;;  %s1890_s10 = inlined_call_operand.vmem [shape: f32[32,1], index: 10, kind: input, shape index: {}]   ;;  %s1891_s11 = inlined_call_operand.vmem [shape: f32[1,32], index: 11, kind: input, shape index: {}]   ;;  %s1892_s12 = inlined_call_operand.<no memory space> [shape: f32[1,1], index: 12, kind: input, shape index: {}]   ;;  %s1893_s13 = inlined_call_operand.hbm [shape: f32[1,1024], index: 13, kind: output, shape index: {}]  }
   0x1   :  { %v18_v0 = vstv %s1892_s12 }
   0x2   :  { %19 = vst [vmem:[#allocation2] sm:$0x1] %v18_v0 }
   0x3   :  { %20 = vsyncpa [#allocation4], 0 }
   0x4   :  { %22 = vsyncpa [#allocation4 + $0x1], 0  ;;  %s1515_s27 = smov 0   ;;  %s1517_s28 = smov 0  }
   0x5   :  { %s1519_s29 = smov 0   ;;  %s1521_s30 = smov 0  }
   0x6 LB: > { %1895 = sst [smem:[#allocation6_spill]] %s1435_s29  ;;  %s1192_s12 = sadd.s32 4294967295, %s1439_s30   ;;  %s1439_s30 = sphi %s1521_s30, %s1903_s30   ;;  %s1435_s29 = sphi %s1519_s29, %s1900_s29   ;;  %s1431_s28 = sphi %s1517_s28, %s1902_s28   ;;  %s1427_s27 = sphi %s1515_s27, %s1901_s27  }
   0x7   : > { %s1193_s14 = sadd.s32 4294967294, %s1439_s30   ;;  %s1538_s15 = sadd.s32 1, %s1439_s30  }
   0x8   : > { %s313_s16 = sadd.s32 1, %s1435_s29  ;;  %s310_s17 = ssub.s32 %s1439_s30, %s1538_s15 }
   0x9   : > { %p323_p0 = scmp.ne.s32.totalorder %s1435_s29, %s1431_s28  ;;  %p311_p1 = scmp.eq.s32.totalorder %s310_s17, 0 }
   0xa   : > { %p324_p2 = scmp.eq.s32.totalorder %s1192_s12, 3  ;;  %p329_p3 = scmp.ne.s32.totalorder %s1431_s28, %s1427_s27 }
   0xb   : > { %p330_p4 = scmp.eq.s32.totalorder %s1193_s14, 3  ;;  %p1196_p7 = scmp.ge.s32.totalorder %s1439_s30, 1 }
   0xc   : > { %s1548_s18 = scalar_select %p311_p1, %s1435_s29, %s313_s16  }
   0xd   : > { %p1550_p5 = por %p324_p2, %p323_p0  ;;  %p1554_p6 = por %p330_p4, %p329_p3 }
   0xe   : > { %1896 = sst [smem:[#allocation7_spill]] %s1548_s18  ;;  %p393_p8 = scmp.lt.s32.totalorder %s1439_s30, 5 }
  0x10   : > { %p394_p9 = pnand %p1196_p7, %p393_p8 }
  0x11   : > { %s1566_s25 = sshll.u32 (!%p394_p9), %s1192_s12, 1  ;;  %s434_s29 = sand.u32 (!%p394_p9), 1, %s1431_s28  }
  0x12   : > { %397 = sbr.rel (%p394_p9) target bundleno = 719 (0x2cf), region = 72  ;;  %p438_p10 = scmp.lt.s32.totalorder (!%p394_p9), %s1566_s25, 7 }
  0x13   : > { %s1197_s18 = sshll.u32 (!%p394_p9), %s434_s29, 1  ;;  %s1129_s24 = scalar_lea.hbm (!%p394_p9), %s1893_s13, %s1566_s25 }
  0x14   : > { %s436_s14 = scalar_lea.vmem (!%p394_p9), [#allocation3], %s1197_s18 }
  0x15   : > { %s1131_s16 = sshll.u32 (!%p394_p9), %s436_s14, 4  ;;  %s1132_s16 = int_to_ptr.vmem [resolvable:$true] %s1131_s16 }
  0x17   : > { %v452_v1 = vld [vmem:[%s1882_s2 + $0x18] sm:$0xff]  ;;  %v451_v2 = vld [vmem:[%s1882_s2 + $0x10] sm:$0xff]  ;;  %v1441_v3 = vmov 0   ;;  %s439_s26 = scalar_select %p438_p10, %s1566_s25, 7  ;;  %v450_v8 = vld [vmem:[%s1882_s2 + $0x8] sm:$0xff]  ;;  %vm490_vm0 = vcmask 1043456  }
  0x18   : > { %1295 = vset.pattern.permute.xlu1 %v1441_v3  ;;  %1294 = vset.pattern.permute.xlu0 %v1441_v3  ;;  %v689_v4 = vld [vmem:[%s1886_s6 + $0x18] sm:$0xff]  ;;  %v567_v6 = vld [vmem:[%s1884_s4 + $0x10] sm:$0xff]  ;;  %v445_v9 = vld [vmem:[%s1881_s1] sm:$0xff]  ;;  %vm477_vm1 = vcmask 31744   ;;  %vm839_vm2 = vcmask 261120   ;;  %vm1110_vm3 = vcmask 1040384  }
  0x19   : > { %470 = vperm.xlu0 %1294, %v452_v1   ;;  %465 = vperm.xlu1 %1295, %v451_v2   ;;  %s1199_s17 = sshll.u32 %s439_s26, 2  ;;  %v568_v5 = vld [vmem:[%s1884_s4 + $0x18] sm:$0xff]  ;;  %v566_v13 = vld [vmem:[%s1884_s4 + $0x8] sm:$0xff]  ;;  %v688_v14 = vld [vmem:[%s1886_s6 + $0x10] sm:$0xff]  ;;  %s1133_s26 = sshll.u32 %s1129_s24, 4  ;;  %s1134_s26 = int_to_ptr.hbm [resolvable:$true] %s1133_s26 }
  0x1a   : > { %1296 = vset.pattern.permute.xlu2 %v1441_v3  ;;  %s441_s12 = scalar_lea.vmem %s1880_s0, %s1199_s17  ;;  %v448_v10 = vld [vmem:[%s1881_s1 + $0x18] sm:$0xff]  ;;  %v449_v15 = vld [vmem:[%s1882_s2] sm:$0xff]  ;;  %v446_v16 = vld [vmem:[%s1881_s1 + $0x8] sm:$0xff]  ;;  %s1119_s17 = scalar_lea.sflag [#allocation4], %s434_s29 }
  0x1b   : > { %707 = vperm.xlu2 %1296, %v689_v4   ;;  %v444_v7 = vld [vmem:[%s441_s12] sm:$0xff]  ;;  %v687_v21 = vld [vmem:[%s1886_s6 + $0x8] sm:$0xff]  ;;  %v447_v23 = vld [vmem:[%s1881_s1 + $0x10] sm:$0xff]  ;;  %s1391_s21 = sshra.s32 %s1134_s26, 4  ;;  %s1397_s12 = scalar_lea.hbm %s1893_s13, 8  ;;  %s1392_s21 = int_to_ptr.hbm [resolvable:$true] %s1391_s21 }
  0x1c   : > { %474 = vst [vmem:[#allocation1] ss:$2 sm:$0xff] %v444_v7  ;;  %v561_v17 = vld [vmem:[%s1883_s3] sm:$0xff]  ;;  %v562_v24 = vld [vmem:[%s1883_s3 + $0x8] sm:$0xff]  ;;  %v818_v27 = vld [vmem:[%s1888_s8 + $0x18] sm:$0xff]  ;;  %s1393_s25 = scalar_lea.hbm %s1392_s21, 2  ;;  %p1398_p0 = scmp.lt.s32.totalorder %s1392_s21, %s1893_s13 }
  0x1d   : > { %v565_v20 = vld [vmem:[%s1884_s4] sm:$0xff]  ;;  %v817_v28 = vld [vmem:[%s1888_s8 + $0x10] sm:$0xff]  ;;  %v816_v29 = vld [vmem:[%s1888_s8 + $0x8] sm:$0xff]  ;;  %p1394_p11 = scmp.ne.s32.totalorder %s1392_s21, %s1393_s25  ;;  %p1399_p1 = scmp.lt.s32.totalorder %s1397_s12, %s1393_s25 }
  0x1e   : > { %v686_v22 = vld [vmem:[%s1886_s6] sm:$0xff]  ;;  %v563_v30 = vld [vmem:[%s1883_s3 + $0x10] sm:$0xff]  ;;  %v941_v33 = vld [vmem:[%s1890_s10 + $0x18] sm:$0xff] }
  0x1f   : > { %v682_v31 = vld [vmem:[%s1885_s5] sm:$0xff]  ;;  %v940_v34 = vld [vmem:[%s1890_s10 + $0x10] sm:$0xff]  ;;  %v564_v35 = vld [vmem:[%s1883_s3 + $0x18] sm:$0xff]  ;;  %p1395_p12 = pnand %p1394_p11, %p1550_p5  ;;  %p1400_p2 = por %p1399_p1, %p1398_p0 }
  0x20   : > { %v815_v32 = vld [vmem:[%s1888_s8] sm:$0xff]  ;;  %v683_v36 = vld [vmem:[%s1885_s5 + $0x8] sm:$0xff]  ;;  %v684_v40 = vld [vmem:[%s1885_s5 + $0x10] sm:$0xff] }
  0x21   : > { %586 = vperm.xlu0 %1294, %v568_v5   ;;  %581 = vperm.xlu1 %1295, %v567_v6   ;;  %v939_v37 = vld [vmem:[%s1890_s10 + $0x8] sm:$0xff]  ;;  %v938_v38 = vld [vmem:[%s1890_s10] sm:$0xff]  ;;  %v685_v41 = vld [vmem:[%s1885_s5 + $0x18] sm:$0xff]  ;;  %p1396_p13 = pneg %p1395_p12 }
  0x22   : > { %v1057_v39 = vld [vmem:[#allocation2] sm:$0x1] }
  0x23   : > { %460 = vperm.xlu2 %1296, %v450_v8   ;;  %v475_v11 = vld.sshfl [vmem:[#allocation1] sm:$0xff pattern:$0x75316420]  ;;  %v476_v12 = vld.sshfl [vmem:[#allocation1 + $0x8] sm:$0xff pattern:$0x75316420]  ;;  %p1401_p3 = pnand %p1400_p2, %p1396_p13 }
  0x24   : > { %1200 = vmatpush.msk.msra.mxu0 %vm490_vm0, %v475_v11  ;;  %1252 = vmatpush.msk.msra.mxu2 %vm490_vm0, %v475_v11  ;;  %589 = vst [vmem:[#allocation1] ss:$2 sm:$0xff] %v444_v7 }
  0x25   : > { %1205 = vmatpush.msk.msra.mxu1 %vm490_vm0, %v476_v12  ;;  %1253 = vmatpush.msk.msra.mxu3 %vm490_vm0, %v476_v12 }
  0x26   : > { %1201 = vmatmul.msk.f32.vlgmr.msra.gmra.mxu0 %vm477_vm1, %v445_v9  ;;  %1204 = vmatmul.msk.f32.vlgmr.msra.gmra.mxu2 %vm477_vm1, %v448_v10 }
  0x27   : > { %1206 = vmatmul.msk.f32.vlgmr.msra.gmra.mxu1 %vm477_vm1, %v445_v9  ;;  %1209 = vmatmul.msk.f32.vlgmr.msra.gmra.mxu3 %vm477_vm1, %v448_v10 }
  0x29   : > { %576 = vperm.xlu0 %1294, %v566_v13   ;;  %702 = vperm.xlu1 %1295, %v688_v14  }
  0x2b   : > { %455 = vperm.xlu2 %1296, %v449_v15   ;;  %v590_v18 = vld.sshfl [vmem:[#allocation1] sm:$0xff pattern:$0x75316420]  ;;  %v591_v19 = vld.sshfl [vmem:[#allocation1 + $0x8] sm:$0xff pattern:$0x75316420] }
  0x2c   : > { %1210 = vmatpush.msk.msrb.mxu2 %vm490_vm0, %v590_v18  ;;  %1215 = vmatpush.msk.msrb.mxu3 %vm490_vm0, %v591_v19  ;;  %710 = vst [vmem:[#allocation1] ss:$2 sm:$0xff] %v444_v7 }
  0x2e   : > { %1202 = vmatmul.msk.f32.gmra.mxu0 %vm477_vm1, %v446_v16  ;;  %1211 = vmatmul.msk.f32.vlgmr.msrb.gmra.mxu2 %vm477_vm1, %v561_v17 }
  0x2f   : > { %1207 = vmatmul.msk.f32.gmra.mxu1 %vm477_vm1, %v446_v16  ;;  %1216 = vmatmul.msk.f32.vlgmr.msrb.gmra.mxu3 %vm477_vm1, %v561_v17 }
  0x31   : > { %571 = vperm.xlu0 %1294, %v565_v20   ;;  %697 = vperm.xlu1 %1295, %v687_v21  }
  0x33   : > { %692 = vperm.xlu2 %1296, %v686_v22   ;;  %v711_v25 = vld.sshfl [vmem:[#allocation1] sm:$0xff pattern:$0x75316420]  ;;  %v712_v26 = vld.sshfl [vmem:[#allocation1 + $0x8] sm:$0xff pattern:$0x75316420] }
  0x34   : > { %1220 = vmatpush.msk.msrb.mxu0 %vm490_vm0, %v711_v25  ;;  %1225 = vmatpush.msk.msrb.mxu1 %vm490_vm0, %v712_v26 }
  0x36   : > { %1203 = vmatmul.msk.f32.gmra.mxu0 %vm477_vm1, %v447_v23  ;;  %1212 = vmatmul.msk.f32.gmra.mxu2 %vm477_vm1, %v562_v24 }
  0x37   : > { %1208 = vmatmul.msk.f32.gmra.mxu1 %vm477_vm1, %v447_v23  ;;  %1217 = vmatmul.msk.f32.gmra.mxu3 %vm477_vm1, %v562_v24 }
  0x39   : > { %836 = vperm.xlu0 %1294, %v818_v27   ;;  %831 = vperm.xlu1 %1295, %v817_v28  }
  0x3b   : > { %826 = vperm.xlu2 %1296, %v816_v29  }
  0x3e   : > { %1213 = vmatmul.msk.f32.gmra.mxu2 %vm477_vm1, %v563_v30  ;;  %1221 = vmatmul.msk.f32.vlgmr.msrb.gmra.mxu0 %vm477_vm1, %v682_v31 }
  0x3f   : > { %1218 = vmatmul.msk.f32.gmra.mxu3 %vm477_vm1, %v563_v30  ;;  %1226 = vmatmul.msk.f32.vlgmr.msrb.gmra.mxu1 %vm477_vm1, %v682_v31 }
  0x41   : > { %821 = vperm.xlu0 %1294, %v815_v32   ;;  %959 = vperm.xlu1 %1295, %v941_v33  }
  0x43   : > { %954 = vperm.xlu2 %1296, %v940_v34  }
  0x46   : > { %1214 = vmatmul.msk.f32.gmra.mxu2 %vm477_vm1, %v564_v35  ;;  %1222 = vmatmul.msk.f32.gmra.mxu0 %vm477_vm1, %v683_v36 }
  0x47   : > { %1219 = vmatmul.msk.f32.gmra.mxu3 %vm477_vm1, %v564_v35  ;;  %1227 = vmatmul.msk.f32.gmra.mxu1 %vm477_vm1, %v683_v36 }
  0x49   : > { %949 = vperm.xlu0 %1294, %v939_v37   ;;  %944 = vperm.xlu1 %1295, %v938_v38  }
  0x4b   : > { %1060 = vperm.xlu2 %1296, %v1057_v39  }
  0x4e   : > { %1223 = vmatmul.msk.f32.gmra.mxu0 %vm477_vm1, %v684_v40 }
  0x4f   : > { %1228 = vmatmul.msk.f32.gmra.mxu1 %vm477_vm1, %v684_v40 }
  0x56   : > { %1224 = vmatmul.msk.f32.gmra.mxu0 %vm477_vm1, %v685_v41 }
  0x57   : > { %1229 = vmatmul.msk.f32.gmra.mxu1 %vm477_vm1, %v685_v41 }
  0x75   : > { %v1695_v45 = vpop.permute.xlu2 %707 }
  0x7d   : > { %v461_v54 = vpop.permute.xlu2 %460 }
  0x85   : > { %v456_v63 = vpop.permute.xlu2 %455 }
  0x8b   : > { %v471_v44 = vpop.permute.xlu0 %470  ;;  %v466_v49 = vpop.permute.xlu1 %465 }
  0x93   : > { %v1697_v51 = vpop.permute.xlu0 %586  ;;  %v582_v57 = vpop.permute.xlu1 %581 }
  0x9b   : > { %v577_v58 = vpop.permute.xlu0 %576  ;;  %v703_v2 = vpop.permute.xlu1 %702 }
  0xa3   : > { %v512_v42 = vpop.f32.mrf.mxu0  ;;  %v572_v8 = vpop.permute.xlu0 %571 }
  0xa4   : > { %v541_v43 = vpop.f32.mrf.mxu1  ;;  %v513_v0 = vadd.f32 %v512_v42, %v456_v63  ;;  %v698_v21 = vpop.permute.xlu1 %697 }
  0xa5   : > { %v542_v1 = vadd.f32 %v541_v43, %v456_v63  ;;  %v693_v43 = vpop.permute.xlu2 %692 }
  0xa6   : > { %1297 = vtanh.f32 %v513_v0 }
  0xa7   : > { %1299 = vtanh.f32 %v542_v1 }
  0xa9   : > { %v521_v46 = vpop.f32.mrf.mxu2 }
  0xaa   : > { %v550_v47 = vpop.f32.mrf.mxu3  ;;  %v522_v3 = vadd.f32 %v521_v46, %v471_v44 }
  0xab   : > { %v515_v48 = vpop.f32.mrf.mxu0  ;;  %v551_v4 = vadd.f32 %v550_v47, %v471_v44 }
  0xac   : > { %v544_v50 = vpop.f32.mrf.mxu1  ;;  %v516_v6 = vadd.f32 %v515_v48, %v461_v54  ;;  %1301 = vtanh.f32 %v522_v3  ;;  %v1703_v16 = vpop.eup %1297 }
  0xad   : > { %v545_v9 = vadd.f32 %v544_v50, %v461_v54  ;;  %1303 = vtanh.f32 %v551_v4  ;;  %v1705_v18 = vpop.eup %1299 }
  0xae   : > { %1305 = vtanh.f32 %v516_v6 }
  0xaf   : > { %1307 = vtanh.f32 %v545_v9 }
  0xb1   : > { %v625_v52 = vpop.f32.mrf.mxu2 }
  0xb2   : > { %v654_v53 = vpop.f32.mrf.mxu3  ;;  %v626_v11 = vadd.f32 %v625_v52, %v572_v8  ;;  %v1302_v20 = vpop.eup %1301 }
  0xb3   : > { %v518_v55 = vpop.f32.mrf.mxu0  ;;  %v655_v13 = vadd.f32 %v654_v53, %v572_v8  ;;  %v1304_v23 = vpop.eup %1303 }
  0xb4   : > { %v547_v56 = vpop.f32.mrf.mxu1  ;;  %v519_v14 = vadd.f32 %v518_v55, %v466_v49  ;;  %1309 = vtanh.f32 %v626_v11  ;;  %v1306_v27 = vpop.eup %1305 }
  0xb5   : > { %v548_v15 = vadd.f32 %v547_v56, %v466_v49  ;;  %1311 = vtanh.f32 %v655_v13  ;;  %v1308_v31 = vpop.eup %1307 }
  0xb6   : > { %1313 = vtanh.f32 %v519_v14 }
  0xb7   : > { %1315 = vtanh.f32 %v548_v15 }
  0xb9   : > { %v628_v59 = vpop.f32.mrf.mxu2 }
  0xba   : > { %v657_v60 = vpop.f32.mrf.mxu3  ;;  %v629_v17 = vadd.f32 %v628_v59, %v577_v58  ;;  %v1707_v33 = vpop.eup %1309 }
  0xbb   : > { %v1699_v61 = vpop.f32.mrf.mxu0  ;;  %v658_v19 = vadd.f32 %v657_v60, %v577_v58  ;;  %v1710_v35 = vpop.eup %1311 }
  0xbc   : > { %v1701_v62 = vpop.f32.mrf.mxu1  ;;  %1317 = vtanh.f32 %v629_v17  ;;  %v1314_v37 = vpop.eup %1313  ;;  %v747_v47 = vadd.f32 %v1699_v61, %v693_v43  ;;  %v1761_v13 = vsub.f32 %v1705_v18, %v1710_v35 }
  0xbd   : > { %1319 = vtanh.f32 %v658_v19  ;;  %v1316_v39 = vpop.eup %1315 }
  0xc1   : > { %v631_v5 = vpop.f32.mrf.mxu2 }
  0xc2   : > { %v660_v7 = vpop.f32.mrf.mxu3  ;;  %v632_v22 = vadd.f32 %v631_v5, %v582_v57  ;;  %v1713_v41 = vpop.eup %1317 }
  0xc3   : > { %v749_v10 = vpop.f32.mrf.mxu0  ;;  %v661_v24 = vadd.f32 %v660_v7, %v582_v57  ;;  %v1715_v42 = vpop.eup %1319 }
  0xc4   : > { %v778_v12 = vpop.f32.mrf.mxu1  ;;  %v750_v28 = vadd.f32 %v749_v10, %v698_v21  ;;  %1321 = vtanh.f32 %v632_v22  ;;  %v1749_v6 = vsub.f32 %v1308_v31, %v1715_v42  ;;  %v1755_v10 = vsub.f32 %v1703_v16, %v1707_v33 }
  0xc5   : > { %v779_v32 = vadd.f32 %v778_v12, %v698_v21  ;;  %1323 = vtanh.f32 %v661_v24  ;;  %v811_v21 = vld [vmem:[%s1887_s7] sm:$0xff]  ;;  %v813_v24 = vld [vmem:[%s1887_s7 + $0x10] sm:$0xff] }
  0xc6   : > { %1325 = vtanh.f32 %v750_v28 }
  0xc7   : > { %1327 = vtanh.f32 %v779_v32 }
  0xc9   : > { %v634_v25 = vpop.f32.mrf.mxu2 }
  0xca   : > { %v663_v29 = vpop.f32.mrf.mxu3  ;;  %v635_v34 = vadd.f32 %v634_v25, %v1697_v51  ;;  %v1717_v46 = vpop.eup %1321  ;;  %v814_v25 = vld [vmem:[%s1887_s7 + $0x18] sm:$0xff] }
  0xcb   : > { %v752_v26 = vpop.f32.mrf.mxu0  ;;  %v664_v36 = vadd.f32 %v663_v29, %v1697_v51  ;;  %v1721_v50 = vpop.eup %1323  ;;  %v776_v51 = vadd.f32 %v1701_v62, %v693_v43  ;;  %v1733_v60 = vsub.f32 %v1314_v37, %v1717_v46 }
  0xcc   : > { %v781_v30 = vpop.f32.mrf.mxu1  ;;  %v753_v38 = vadd.f32 %v752_v26, %v703_v2  ;;  %1329 = vtanh.f32 %v635_v34  ;;  %v1326_v53 = vpop.eup %1325  ;;  %v1739_v62 = vsub.f32 %v1316_v39, %v1721_v50 }
  0xcd   : > { %v782_v40 = vadd.f32 %v781_v30, %v703_v2  ;;  %1331 = vtanh.f32 %v664_v36  ;;  %v1328_v54 = vpop.eup %1327  ;;  %v1744_v2 = vsub.f32 %v1306_v27, %v1713_v41  ;;  %v837_v30 = vpop.permute.xlu0 %836 }
  0xce   : > { %1333 = vtanh.f32 %v753_v38  ;;  %v798_v12 = vmul.f32 %v1328_v54, %v1749_v6  ;;  %v827_v34 = vpop.permute.xlu2 %826  ;;  %v832_v37 = vpop.permute.xlu1 %831 }
  0xcf   : > { %1335 = vtanh.f32 %v782_v40  ;;  %v797_v9 = vmul.f32 %v1326_v53, %v1744_v2 }
  0xd1   : > { %v805_v16 = vadd.f32 %v1713_v41, %v797_v9 }
  0xd2   : > { %v1725_v55 = vpop.eup %1329 }
  0xd3   : > { %v755_v44 = vpop.f32.mrf.mxu0  ;;  %v1727_v56 = vpop.eup %1331  ;;  %v1730_v59 = vsub.f32 %v1302_v20, %v1725_v55  ;;  %v806_v20 = vadd.f32 %v1715_v42, %v798_v12 }
  0xd4   : > { %v756_v48 = vadd.f32 %v755_v44, %v1695_v45  ;;  %v784_v49 = vpop.f32.mrf.mxu1  ;;  %v1334_v57 = vpop.eup %1333 }
  0xd5   : > { %v785_v52 = vadd.f32 %v784_v49, %v1695_v45  ;;  %v1336_v58 = vpop.eup %1335  ;;  %v1736_v45 = vsub.f32 %v1304_v23, %v1727_v56  ;;  %v799_v1 = vmul.f32 %v1334_v57, %v1733_v60  ;;  %v812_v23 = vld [vmem:[%s1887_s7 + $0x8] sm:$0xff]  ;;  %v822_v43 = vpop.permute.xlu0 %821 }
  0xd6   : > { %1337 = vtanh.f32 %v756_v48  ;;  %v800_v5 = vmul.f32 %v1336_v58, %v1739_v62 }
  0xd7   : > { %1339 = vtanh.f32 %v785_v52  ;;  %v807_v14 = vadd.f32 %v1717_v46, %v799_v1 }
  0xd8   : > { %1341 = vtanh.f32 %v747_v47  ;;  %v808_v17 = vadd.f32 %v1721_v50, %v800_v5 }
  0xd9   : > { %1343 = vtanh.f32 %v776_v51 }
  0xdc   : > { %v1338_v61 = vpop.eup %1337 }
  0xdd   : > { %v1340_v63 = vpop.eup %1339  ;;  %v801_v0 = vmul.f32 %v1338_v61, %v1730_v59 }
  0xde   : > { %v1342_v3 = vpop.eup %1341  ;;  %v802_v4 = vmul.f32 %v1340_v63, %v1736_v45 }
  0xdf   : > { %v1344_v7 = vpop.eup %1343  ;;  %v809_v8 = vadd.f32 %v1725_v55, %v801_v0  ;;  %v795_v15 = vmul.f32 %v1342_v3, %v1755_v10 }
  0xe0   : > { %v810_v11 = vadd.f32 %v1727_v56, %v802_v4  ;;  %v796_v19 = vmul.f32 %v1344_v7, %v1761_v13 }
  0xe1   : > { %864 = vmatpush.msra.mxu2 %v809_v8  ;;  %v803_v18 = vadd.f32 %v1707_v33, %v795_v15 }
  0xe2   : > { %893 = vmatpush.msra.mxu3 %v810_v11  ;;  %v804_v22 = vadd.f32 %v1710_v35, %v796_v19 }
  0xe3   : > { %865 = vmatpush.msra.mxu2 %v807_v14 }
  0xe4   : > { %894 = vmatpush.msra.mxu3 %v808_v17 }
  0xe5   : > { %866 = vmatpush.msra.mxu2 %v805_v16 }
  0xe6   : > { %895 = vmatpush.msra.mxu3 %v806_v20 }
  0xe7   : > { %867 = vmatpush.msra.mxu2 %v803_v18 }
  0xe8   : > { %896 = vmatpush.msra.mxu3 %v804_v22  ;;  %1230 = vmatmul.msk.f32.vlgmr.msra.gmra.mxu2 %vm839_vm2, %v811_v21 }
  0xe9   : > { %1234 = vmatmul.msk.f32.vlgmr.msra.gmra.mxu3 %vm839_vm2, %v811_v21  ;;  %v934_v21 = vld [vmem:[%s1889_s9] sm:$0xff] }
  0xf0   : > { %1231 = vmatmul.msk.f32.gmra.mxu2 %vm839_vm2, %v812_v23 }
  0xf1   : > { %1235 = vmatmul.msk.f32.gmra.mxu3 %vm839_vm2, %v812_v23  ;;  %v935_v23 = vld [vmem:[%s1889_s9 + $0x8] sm:$0xff] }
  0xf8   : > { %1232 = vmatmul.msk.f32.gmra.mxu2 %vm839_vm2, %v813_v24 }
  0xf9   : > { %1236 = vmatmul.msk.f32.gmra.mxu3 %vm839_vm2, %v813_v24  ;;  %v936_v24 = vld [vmem:[%s1889_s9 + $0x10] sm:$0xff] }
 0x100   : > { %1233 = vmatmul.msk.f32.gmra.mxu2 %vm839_vm2, %v814_v25 }
 0x101   : > { %1237 = vmatmul.msk.f32.gmra.mxu3 %vm839_vm2, %v814_v25  ;;  %v937_v25 = vld [vmem:[%s1889_s9 + $0x18] sm:$0xff] }
 0x16b   : > { %v869_v26 = vpop.f32.mrf.mxu2 }
 0x16c   : > { %v898_v27 = vpop.f32.mrf.mxu3  ;;  %v870_v47 = vadd.f32 %v869_v26, %v822_v43 }
 0x16d   : > { %v899_v51 = vadd.f32 %v898_v27, %v822_v43 }
 0x173   : > { %v872_v28 = vpop.f32.mrf.mxu2 }
 0x174   : > { %v901_v29 = vpop.f32.mrf.mxu3  ;;  %v873_v36 = vadd.f32 %v872_v28, %v827_v34 }
 0x175   : > { %v902_v38 = vadd.f32 %v901_v29, %v827_v34  ;;  %v950_v34 = vpop.permute.xlu0 %949 }
 0x176   : > { %1345 = vtanh.f32 %v873_v36 }
 0x177   : > { %1347 = vtanh.f32 %v902_v38 }
 0x17b   : > { %v875_v31 = vpop.f32.mrf.mxu2 }
 0x17c   : > { %v904_v32 = vpop.f32.mrf.mxu3  ;;  %v876_v39 = vadd.f32 %v875_v31, %v832_v37  ;;  %v1346_v53 = vpop.eup %1345 }
 0x17d   : > { %v905_v40 = vadd.f32 %v904_v32, %v832_v37  ;;  %v1348_v54 = vpop.eup %1347  ;;  %v920_v9 = vmul.f32 %v1346_v53, %v1744_v2  ;;  %v955_v37 = vpop.permute.xlu2 %954 }
 0x17e   : > { %1349 = vtanh.f32 %v876_v39  ;;  %v921_v12 = vmul.f32 %v1348_v54, %v1749_v6 }
 0x17f   : > { %1351 = vtanh.f32 %v905_v40  ;;  %v928_v16 = vadd.f32 %v1713_v41, %v920_v9 }
 0x180   : > { %v929_v20 = vadd.f32 %v1715_v42, %v921_v12 }
 0x183   : > { %v878_v44 = vpop.f32.mrf.mxu2 }
 0x184   : > { %v879_v48 = vadd.f32 %v878_v44, %v837_v30  ;;  %v907_v49 = vpop.f32.mrf.mxu3  ;;  %v1350_v57 = vpop.eup %1349 }
 0x185   : > { %v908_v52 = vadd.f32 %v907_v49, %v837_v30  ;;  %v1352_v58 = vpop.eup %1351  ;;  %v922_v1 = vmul.f32 %v1350_v57, %v1733_v60  ;;  %v960_v30 = vpop.permute.xlu1 %959 }
 0x186   : > { %1353 = vtanh.f32 %v879_v48  ;;  %v923_v5 = vmul.f32 %v1352_v58, %v1739_v62 }
 0x187   : > { %1355 = vtanh.f32 %v908_v52  ;;  %v930_v14 = vadd.f32 %v1717_v46, %v922_v1 }
 0x188   : > { %1357 = vtanh.f32 %v870_v47  ;;  %v931_v17 = vadd.f32 %v1721_v50, %v923_v5 }
 0x189   : > { %1359 = vtanh.f32 %v899_v51 }
 0x18c   : > { %v1354_v61 = vpop.eup %1353 }
 0x18d   : > { %v1356_v63 = vpop.eup %1355  ;;  %v924_v0 = vmul.f32 %v1354_v61, %v1730_v59  ;;  %v945_v43 = vpop.permute.xlu1 %944 }
 0x18e   : > { %v1358_v3 = vpop.eup %1357  ;;  %v925_v4 = vmul.f32 %v1356_v63, %v1736_v45 }
 0x18f   : > { %v1360_v7 = vpop.eup %1359  ;;  %v932_v8 = vadd.f32 %v1725_v55, %v924_v0  ;;  %v918_v15 = vmul.f32 %v1358_v3, %v1755_v10 }
 0x190   : > { %v933_v11 = vadd.f32 %v1727_v56, %v925_v4  ;;  %v919_v19 = vmul.f32 %v1360_v7, %v1761_v13 }
 0x191   : > { %986 = vmatpush.msra.mxu0 %v932_v8  ;;  %v926_v18 = vadd.f32 %v1707_v33, %v918_v15 }
 0x192   : > { %1015 = vmatpush.msra.mxu1 %v933_v11  ;;  %v927_v22 = vadd.f32 %v1710_v35, %v919_v19 }
 0x193   : > { %987 = vmatpush.msra.mxu0 %v930_v14 }
 0x194   : > { %1016 = vmatpush.msra.mxu1 %v931_v17 }
 0x195   : > { %988 = vmatpush.msra.mxu0 %v928_v16 }
 0x196   : > { %1017 = vmatpush.msra.mxu1 %v929_v20 }
 0x197   : > { %989 = vmatpush.msra.mxu0 %v926_v18 }
 0x198   : > { %1018 = vmatpush.msra.mxu1 %v927_v22  ;;  %1238 = vmatmul.msk.f32.vlgmr.msra.gmra.mxu0 %vm839_vm2, %v934_v21 }
 0x199   : > { %1242 = vmatmul.msk.f32.vlgmr.msra.gmra.mxu1 %vm839_vm2, %v934_v21 }
 0x1a0   : > { %1239 = vmatmul.msk.f32.gmra.mxu0 %vm839_vm2, %v935_v23 }
 0x1a1   : > { %1243 = vmatmul.msk.f32.gmra.mxu1 %vm839_vm2, %v935_v23 }
 0x1a8   : > { %1240 = vmatmul.msk.f32.gmra.mxu0 %vm839_vm2, %v936_v24 }
 0x1a9   : > { %1244 = vmatmul.msk.f32.gmra.mxu1 %vm839_vm2, %v936_v24 }
 0x1b0   : > { %1241 = vmatmul.msk.f32.gmra.mxu0 %vm839_vm2, %v937_v25 }
 0x1b1   : > { %1245 = vmatmul.msk.f32.gmra.mxu1 %vm839_vm2, %v937_v25 }
 0x215   : > { %v991_v26 = vpop.f32.mrf.mxu0 }
 0x216   : > { %v1020_v27 = vpop.f32.mrf.mxu1  ;;  %v992_v47 = vadd.f32 %v991_v26, %v945_v43 }
 0x217   : > { %v1021_v51 = vadd.f32 %v1020_v27, %v945_v43 }
 0x21d   : > { %v994_v28 = vpop.f32.mrf.mxu0 }
 0x21e   : > { %v1023_v29 = vpop.f32.mrf.mxu1  ;;  %v995_v36 = vadd.f32 %v994_v28, %v950_v34 }
 0x21f   : > { %v1024_v38 = vadd.f32 %v1023_v29, %v950_v34 }
 0x220   : > { %1361 = vtanh.f32 %v995_v36 }
 0x221   : > { %1363 = vtanh.f32 %v1024_v38 }
 0x225   : > { %v997_v31 = vpop.f32.mrf.mxu0 }
 0x226   : > { %v1026_v32 = vpop.f32.mrf.mxu1  ;;  %v998_v39 = vadd.f32 %v997_v31, %v955_v37  ;;  %v1362_v53 = vpop.eup %1361 }
 0x227   : > { %v1027_v40 = vadd.f32 %v1026_v32, %v955_v37  ;;  %v1364_v54 = vpop.eup %1363  ;;  %v1042_v9 = vmul.f32 %v1362_v53, %v1744_v2 }
 0x228   : > { %1365 = vtanh.f32 %v998_v39  ;;  %v1043_v12 = vmul.f32 %v1364_v54, %v1749_v6 }
 0x229   : > { %1367 = vtanh.f32 %v1027_v40 }
 0x22d   : > { %v1000_v44 = vpop.f32.mrf.mxu0 }
 0x22e   : > { %v1001_v48 = vadd.f32 %v1000_v44, %v960_v30  ;;  %v1029_v49 = vpop.f32.mrf.mxu1  ;;  %v1366_v57 = vpop.eup %1365 }
 0x22f   : > { %v1030_v52 = vadd.f32 %v1029_v49, %v960_v30  ;;  %v1368_v58 = vpop.eup %1367  ;;  %v1044_v1 = vmul.f32 %v1366_v57, %v1733_v60 }
 0x230   : > { %1369 = vtanh.f32 %v1001_v48  ;;  %v1045_v5 = vmul.f32 %v1368_v58, %v1739_v62 }
 0x231   : > { %1371 = vtanh.f32 %v1030_v52  ;;  %v1052_v14 = vadd.f32 %v1717_v46, %v1044_v1  ;;  %v1056_v46 = vld [vmem:[%s1891_s11] sm:$0x1] }
 0x232   : > { %1373 = vtanh.f32 %v992_v47  ;;  %v1053_v60 = vadd.f32 %v1721_v50, %v1045_v5 }
 0x233   : > { %1375 = vtanh.f32 %v1021_v51 }
 0x236   : > { %v1370_v61 = vpop.eup %1369 }
 0x237   : > { %v1372_v63 = vpop.eup %1371  ;;  %v1046_v0 = vmul.f32 %v1370_v61, %v1730_v59 }
 0x238   : > { %v1374_v3 = vpop.eup %1373  ;;  %v1047_v4 = vmul.f32 %v1372_v63, %v1736_v45 }
 0x239   : > { %v1376_v7 = vpop.eup %1375  ;;  %v1054_v8 = vadd.f32 %v1725_v55, %v1046_v0  ;;  %v1040_v59 = vmul.f32 %v1374_v3, %v1755_v10  ;;  %v1050_v55 = vadd.f32 %v1713_v41, %v1042_v9  ;;  %v1061_v41 = vpop.permute.xlu2 %1060 }
 0x23a   : > { %v1055_v11 = vadd.f32 %v1727_v56, %v1047_v4  ;;  %v1041_v45 = vmul.f32 %v1376_v7, %v1761_v13  ;;  %v1051_v56 = vadd.f32 %v1715_v42, %v1043_v12  ;;  %v1113_v42 = vlaneseq }
 0x23b   : > { %1079 = vmatpush.msrb.mxu2 %v1054_v8  ;;  %v1048_v62 = vadd.f32 %v1707_v33, %v1040_v59  ;;  %v1063_v33 = vperm.slane %v1061_v41, 0 }
 0x23c   : > { %1099 = vmatpush.msrb.mxu3 %v1055_v11  ;;  %v1049_v2 = vadd.f32 %v1710_v35, %v1041_v45  ;;  %vm1115_vm4 = vcmp.lt.s32.totalorder %v1113_v42, 256 }
 0x23d   : > { %1080 = vmatpush.msrb.mxu2 %v1052_v14 }
 0x23e   : > { %1100 = vmatpush.msrb.mxu3 %v1053_v60 }
 0x23f   : > { %1081 = vmatpush.msrb.mxu2 %v1050_v55 }
 0x240   : > { %1101 = vmatpush.msrb.mxu3 %v1051_v56 }
 0x241   : > { %1082 = vmatpush.msrb.mxu2 %v1048_v62 }
 0x242   : > { %1102 = vmatpush.msrb.mxu3 %v1049_v2  ;;  %1246 = vmatmul.msk.f32.vlgmr.msrb.gmra.mxu2 %vm839_vm2, %v1056_v46 }
 0x243   : > { %1247 = vmatmul.msk.f32.vlgmr.msrb.gmra.mxu3 %vm839_vm2, %v1056_v46 }
 0x2c5   : > { %v1084_v50 = vpop.f32.mrf.mxu2 }
 0x2c6   : > { %v1104_v6 = vpop.f32.mrf.mxu3  ;;  %v1085_v35 = vadd.f32 %v1084_v50, %v1063_v33 }
 0x2c7   : > { %v1105_v10 = vadd.f32 %v1104_v6, %v1063_v33 }
 0x2c9   : > { %v1109_v13 = vrot.slane %v1105_v10, 7 }
 0x2cb   : > { %v1111_v15 = vsel %vm1110_vm3, %v1085_v35, %v1109_v13 }
 0x2cc   : > { %1117 = vst.msk [vmem:[%s436_s14] sm:$0x3] %vm1115_vm4, %v1111_v15 }
 0x2cd   : > { %1404 = shalt.err (!%p1401_p3)
}
 0x2ce   : > { %1254 = dma.vmem_to_hbm [thread:$0]  (%p1550_p5), %s1132_s16, 32, %s1134_s26, %s1119_s17  }
 0x2cf PF: > { %p1260_p4 = scmp.ge.s32.totalorder %s1439_s30, 2  ;;  %s1145_s29 = sand.u32 1, %s1427_s27  }
 0x2d0   : > { %s1146_s14 = scalar_lea.sflag [#allocation4], %s1145_s29 }
 0x2d1   : > { %p1257_p7 = pnand %p1260_p4, %p1554_p6 }
 0x2d3   : > { %p1258_p8 = pneg %p1257_p7 }
 0x2d5   : > { %1422 = dma.done.wait (%p1258_p8), %s1146_s14, 32  }
 0x2d6   : > { %1424 = vsyncadd (%p1258_p8), %s1146_s14, 4294967264  ;;  %s1899_s21 = sld [smem:[#allocation6_spill]]  ;;  %p25_p9 = scmp.ge.s32.totalorder %s1538_s15, 6  }
 0x2d7   : > { %s1900_s29 = sld [smem:[#allocation7_spill]]  ;;  %s1901_s27 = smov %s1431_s28 }
 0x2d8   : > { %s1903_s30 = smov %s1538_s15  ;;  %27 = sbr.rel (!%p25_p9) target bundleno = 6 (0x6), region = 107 }
 0x2dc   : > { %s1902_s28 = smov %s1899_s21 }
 0x2dd   :  { %1152 = vsyncpa [#allocation4], 1 }
 0x2de   :  { %1154 = vsyncpa [#allocation4 + $0x1], 1 }

</bundles_post_ra>
